<compile_context>
chip_gen: v5e
topology: v5e:2x2
jax: 0.10.0
libtpu: 0.0.40
codegen_flags: <defaults>
</compile_context>

<pallas_src>
import functools

import numpy as np
import jax
import jax.numpy as jnp
from jax.experimental import pallas as pl
from jax.experimental.pallas import tpu as pltpu


def _round_down8(v):
    return max((v // 8) * 8, 0)


def _pool_selection_matrix(h, w, pool, dtype):
    """(H*W, Ho*Wo) 0/1 matrix; column (rh*Wo+rw) selects pool window (rh, rw)."""
    ho, wo = h // pool, w // pool
    sel_h = (np.arange(h)[:, None] // pool == np.arange(ho)[None, :]).astype(np.float32)
    sel_w = (np.arange(w)[:, None] // pool == np.arange(wo)[None, :]).astype(np.float32)
    return jnp.asarray(np.kron(sel_h, sel_w), dtype=dtype)  # (H*W, Ho*Wo)


def _make_kernel(*, c_in, out_dim, pool, c_blk, blocked):
    """Kernel body specialized on static shapes / case."""
    inv_scale = 1.0 / float(pool * pool)
    pad = out_dim > c_in

    def _pool(x, p_ref):
        if pool > 1:
            acc = jnp.dot(x, p_ref[...], preferred_element_type=jnp.float32)
            return acc * inv_scale
        return x

    if blocked:
        # Grid: (batch, output-channel-block). x_ref: (c_blk, H*W), o_ref: (c_blk, Ho*Wo)
        ragged = pad and (c_in % c_blk != 0)

        def body(x_ref, p_ref, o_ref):
            if pad:
                base = pl.program_id(1) * c_blk

                @pl.when(base >= c_in)          # pure zero-pad block: skip matmul entirely
                def _():
                    o_ref[...] = jnp.zeros_like(o_ref)

                @pl.when(base < c_in)
                def _():
                    out = _pool(x_ref[...], p_ref)
                    if ragged:                  # block straddles the c_in boundary
                        row = jax.lax.broadcasted_iota(jnp.int32, out.shape, 0)
                        out = jnp.where(row + base < c_in, out, 0)
                    o_ref[...] = out.astype(o_ref.dtype)
            else:
                o_ref[...] = _pool(x_ref[...], p_ref).astype(o_ref.dtype)
    else:
        # Grid: (batch,). x_ref: (c_in, H*W), o_ref: (out_dim, Ho*Wo)
        def body(x_ref, p_ref, o_ref):
            if pad:
                out = _pool(x_ref[...], p_ref)                     # (c_in, Ho*Wo)
                o_ref[0:c_in, :] = out.astype(o_ref.dtype)
                o_ref[c_in:, :] = jnp.zeros(
                    (out_dim - c_in, out.shape[1]), dtype=o_ref.dtype)
            else:
                out = _pool(x_ref[0:out_dim, :], p_ref)            # slice before pooling
                o_ref[...] = out.astype(o_ref.dtype)

    if pool > 1:
        return body
    return lambda x_ref, o_ref: body(x_ref, None, o_ref)


def _choose_c_blk(c_in, out_dim, hw, how, bpe):
    """Largest channel block (multiple of 8, <=256) whose per-step footprint fits ~12 MiB."""
    c_blk = min(_round_down8(min(c_in, out_dim)), 256)

    def step_bytes(cb):
        # double-buffered input + output blocks + f32 matmul temporary
        return 2 * cb * hw * bpe + 2 * cb * how * bpe + cb * how * 4

    while c_blk > 8 and step_bytes(c_blk) > (12 << 20):
        c_blk = max(_round_down8(c_blk // 2), 8)
    return c_blk


@functools.partial(jax.jit, static_argnames=("out_dim", "pool_size"))
def padding_shortcut(x, out_dim, pool_size=2):
    """Pallas `_padding_shortcut` with pool_layer = AvgPool2d(pool_size) (or None if 1)."""
    n, c_in, h, w = x.shape
    pool = int(pool_size) if pool_size else 1
    ho, wo = (h // pool, w // pool) if pool > 1 else (h, w)
    hw, how = h * w, ho * wo
    bpe = jnp.dtype(x.dtype).itemsize

    blocked = (c_in >= 8) and (out_dim >= 8)
    if blocked:
        c_blk = _choose_c_blk(c_in, out_dim, hw, how, bpe)
        nc = pl.cdiv(out_dim, c_blk)
        max_in_blk = pl.cdiv(c_in, c_blk) - 1
        grid = (n, nc)
        # Clamp input block index for pure-pad output blocks; the repeated index across
        # consecutive steps lets the pipeline elide those DMAs.
        x_idx = lambda b, j: (b, jnp.minimum(j, max_in_blk), 0)
        o_idx = lambda b, j: (b, j, 0)
        p_idx = lambda b, j: (0, 0)
        x_block = (None, c_blk, hw)
        o_block = (None, c_blk, how)
        dims = ("parallel", "parallel")
        c_rows = c_blk
    else:
        # Tiny channel counts: one full-extent block per batch element.
        grid = (n,)
        x_idx = lambda b: (b, 0, 0)
        o_idx = lambda b: (b, 0, 0)
        p_idx = lambda b: (0, 0)
        x_block = (None, c_in, hw)
        o_block = (None, out_dim, how)
        dims = ("parallel",)
        c_rows = max(c_in, out_dim)

    kernel = _make_kernel(c_in=c_in, out_dim=out_dim, pool=pool,
                          c_blk=(c_blk if blocked else 0), blocked=blocked)

    x_flat = x.reshape(n, c_in, hw)          # free: merges trailing contiguous dims
    in_specs = [pl.BlockSpec(x_block, x_idx)]
    operands = [x_flat]
    if pool > 1:
        p_mat = _pool_selection_matrix(h, w, pool, x.dtype)
        in_specs.append(pl.BlockSpec((hw, how), p_idx))   # constant index -> VMEM resident
        operands.append(p_mat)

    # Explicit VMEM budget (matters on v7x: 64 MiB physical per TC).
    vmem_est = (2 * c_rows * hw * bpe            # double-buffered input blocks
                + 2 * c_rows * how * bpe         # double-buffered output blocks
                + (hw * how * bpe if pool > 1 else 0)  # resident pool matrix
                + 2 * c_rows * how * 4)          # f32 temporaries
    vmem_limit = int(min(max(2 * vmem_est, 4 << 20), 48 << 20))

    out_flat = pl.pallas_call(
        kernel,
        out_shape=jax.ShapeDtypeStruct((n, out_dim, how), x.dtype),
        grid=grid,
        in_specs=in_specs,
        out_specs=pl.BlockSpec(o_block, o_idx),
        compiler_params=pltpu.CompilerParams(
            dimension_semantics=dims,
            vmem_limit_bytes=vmem_limit),
    )(*operands)

    return out_flat.reshape(n, out_dim, ho, wo)   # free: splits trailing dim


def _reference(x, out_dim, pool_size):
    n, c, h, w = x.shape
    if pool_size > 1:
        x = x.reshape(n, c, h // pool_size, pool_size,
                      w // pool_size, pool_size).mean(axis=(3, 5))
    if c >= out_dim:
        return x[:, :out_dim]
    pad = jnp.zeros((n, out_dim - c) + x.shape[2:], dtype=x.dtype)
    return jnp.concatenate([x, pad], axis=1)


if __name__ == "__main__":
    key = jax.random.PRNGKey(0)
    k1, k2, k3 = jax.random.split(key, 3)
    x_small = jax.random.normal(k1, (2, 4, 16, 16), dtype=jnp.float32)
    x_big = jax.random.normal(k2, (2, 16, 16, 16), dtype=jnp.float32)
    x_rag = jax.random.normal(k3, (2, 12, 16, 16), dtype=jnp.float32)

    # Case 1: in_dim < out_dim -> zero-pad channels (4 -> 8), AvgPool2d(2). (single block)
    out = jax.block_until_ready(padding_shortcut(x_small, out_dim=8, pool_size=2))
    assert out.shape == (2, 8, 8, 8)
    assert jnp.allclose(out, _reference(x_small, 8, 2), atol=1e-5, rtol=1e-5)

    # Case 2: in_dim >= out_dim -> channel slice (4 -> 2), AvgPool2d(2). (single block)
    out = jax.block_until_ready(padding_shortcut(x_small, out_dim=2, pool_size=2))
    assert out.shape == (2, 2, 8, 8)
    assert jnp.allclose(out, _reference(x_small, 2, 2), atol=1e-5, rtol=1e-5)

    # Case 3: pool_layer = None (identity), zero-pad 4 -> 8.
    out = jax.block_until_ready(padding_shortcut(x_small, out_dim=8, pool_size=1))
    assert out.shape == (2, 8, 16, 16)
    assert jnp.allclose(out, _reference(x_small, 8, 1), atol=1e-5, rtol=1e-5)

    # Case 4: channel-blocked path, slice 16 -> 8 (only kept channels are DMA'd).
    out = jax.block_until_ready(padding_shortcut(x_big, out_dim=8, pool_size=2))
    assert out.shape == (2, 8, 8, 8)
    assert jnp.allclose(out, _reference(x_big, 8, 2), atol=1e-5, rtol=1e-5)

    # Case 5: channel-blocked path, zero-pad 16 -> 32 (pure-pad blocks skip the matmul).
    out = jax.block_until_ready(padding_shortcut(x_big, out_dim=32, pool_size=2))
    assert out.shape == (2, 32, 8, 8)
    assert jnp.allclose(out, _reference(x_big, 32, 2), atol=1e-5, rtol=1e-5)

    # Case 6: ragged pad, 12 -> 32 with c_blk=8 (exercises the straddling-block mask).
    out = jax.block_until_ready(padding_shortcut(x_rag, out_dim=32, pool_size=2))
    assert out.shape == (2, 32, 8, 8)
    assert jnp.allclose(out, _reference(x_rag, 32, 2), atol=1e-5, rtol=1e-5)

    # Case 7: slice with non-multiple-of-block out_dim (16 -> 12), partial output block.
    out = jax.block_until_ready(padding_shortcut(x_big, out_dim=12, pool_size=2))
    assert out.shape == (2, 12, 8, 8)
    assert jnp.allclose(out, _reference(x_big, 12, 2), atol=1e-5, rtol=1e-5)

    print("KERNEL_OK")
</pallas_src>

<mosaic_0001>
module attributes {stable_mosaic.version = 11 : i64} {
  func.func @body(%arg0: i32, %arg1: memref<1x4x256xf32, #tpu.memory_space<vmem>>, %arg2: memref<256x64xf32, #tpu.memory_space<vmem>>, %arg3: memref<1x8x64xf32, #tpu.memory_space<vmem>>) attributes {dimension_semantics = [#tpu.dimension_semantics<parallel>], iteration_bounds = array<i64: 2>, scalar_prefetch = 0 : i64, scratch_operands = 0 : i64, tpu.core_type = #tpu.core_type<tc>, window_params = [{transform_indices = @transform_0, window_bounds = array<i64: 1, 4, 256>}, {pipeline_mode = #tpu.pipeline_mode<synchronous>, transform_indices = @transform_1, window_bounds = array<i64: 256, 64>}, {transform_indices = @transform_2, window_bounds = array<i64: 1, 8, 64>}]} {
    %c0 = arith.constant 0 : index
    %c0_0 = arith.constant 0 : index
    %c0_1 = arith.constant 0 : index
    %0 = vector.load %arg1[%c0, %c0_0, %c0_1] : memref<1x4x256xf32, #tpu.memory_space<vmem>>, vector<1x4x256xf32>
    %1 = vector.shape_cast %0 : vector<1x4x256xf32> to vector<4x256xf32>
    %c0_2 = arith.constant 0 : index
    %c0_3 = arith.constant 0 : index
    %2 = vector.load %arg2[%c0_2, %c0_3] : memref<256x64xf32, #tpu.memory_space<vmem>>, vector<256x64xf32>
    %cst = arith.constant dense<0.000000e+00> : vector<4x64xf32>
    %3 = tpu.matmul %1, %2, %cst {dimension_numbers = #tpu.dot_dimension_numbers<[1], [0], [0], [1], [0, 0, 1, 1], [], []>} : vector<4x256xf32>, vector<256x64xf32>, vector<4x64xf32> -> vector<4x64xf32>
    %cst_4 = arith.constant 2.500000e-01 : f32
    %4 = vector.broadcast %cst_4 : f32 to vector<4x64xf32>
    %5 = arith.mulf %3, %4 : vector<4x64xf32>
    %c0_5 = arith.constant 0 : index
    %c0_6 = arith.constant 0 : index
    %c0_7 = arith.constant 0 : index
    %6 = vector.load %arg3[%c0_5, %c0_6, %c0_7] : memref<1x8x64xf32, #tpu.memory_space<vmem>>, vector<1x4x64xf32>
    %7 = vector.shape_cast %6 : vector<1x4x64xf32> to vector<4x64xf32>
    %8 = vector.shape_cast %5 : vector<4x64xf32> to vector<1x4x64xf32>
    tpu.vector_store %arg3[%c0_5, %c0_6, %c0_7], %8 {strides = array<i32>} : memref<1x8x64xf32, #tpu.memory_space<vmem>>, vector<1x4x64xf32>,
    %cst_8 = arith.constant 0.000000e+00 : f32
    %9 = vector.broadcast %cst_8 : f32 to vector<4x64xf32>
    %c0_9 = arith.constant 0 : index
    %c4 = arith.constant 4 : index
    %c0_10 = arith.constant 0 : index
    %10 = vector.load %arg3[%c0_9, %c4, %c0_10] : memref<1x8x64xf32, #tpu.memory_space<vmem>>, vector<1x4x64xf32>
    %11 = vector.shape_cast %10 : vector<1x4x64xf32> to vector<4x64xf32>
    %12 = vector.shape_cast %9 : vector<4x64xf32> to vector<1x4x64xf32>
    tpu.vector_store %arg3[%c0_9, %c4, %c0_10], %12 {strides = array<i32>} : memref<1x8x64xf32, #tpu.memory_space<vmem>>, vector<1x4x64xf32>,
    return
  }
  func.func @transform_0(%arg0: i32) -> (i32, i32, i32) {
    %c0_i32 = arith.constant 0 : i32
    %c0_i32_0 = arith.constant 0 : i32
    %c0_i32_1 = arith.constant 0 : i32
    return %arg0, %c0_i32, %c0_i32_0 : i32, i32, i32
  }
  func.func @transform_1(%arg0: i32) -> (i32, i32) {
    %c0_i32 = arith.constant 0 : i32
    %c0_i32_0 = arith.constant 0 : i32
    %c0_i32_1 = arith.constant 0 : i32
    return %c0_i32, %c0_i32_0 : i32, i32
  }
  func.func @transform_2(%arg0: i32) -> (i32, i32, i32) {
    %c0_i32 = arith.constant 0 : i32
    %c0_i32_0 = arith.constant 0 : i32
    %c0_i32_1 = arith.constant 0 : i32
    return %arg0, %c0_i32, %c0_i32_0 : i32, i32, i32
  }
}

</mosaic_0001>

<bundles_post_ra>
// kernel: padding_shortcut.1
= control target key start
LH: loop header
LB: loop body
LE: loop exit
PB: predicated region body
PF: predicated region fallthrough
CT: control target
= control target key end

     0   :  { %7 = vsyncpa [#allocation3], 0  ;;  %s403_s9 = smov 0   ;;  %s430_s0 = inlined_call_operand.vmem [shape: f32[2,4,256], index: 0, kind: input, shape index: {}]   ;;  %s431_s1 = inlined_call_operand.hbm [shape: f32[256,64], index: 1, kind: input, shape index: {}]   ;;  %s432_s2 = inlined_call_operand.vmem [shape: f32[2,8,64], index: 2, kind: output, shape index: {}]  }
   0x1 LB: > { %s102_s12 = sshll.u32 %s431_s1, 4  ;;  %s307_s13 = sadd.s32 4294967295, %s382_s9   ;;  %s382_s9 = sphi %s403_s9, %s13_s9   ;;  %s103_s12 = int_to_ptr.hbm [resolvable:$true] %s102_s12 }
   0x2   : > { %p309_p0 = scmp.ge.s32.totalorder %s382_s9, 1  ;;  %p91_p1 = scmp.lt.s32.totalorder %s382_s9, 3 }
   0x3   : > { %p328_p2 = scmp.eq.s32.totalorder %s307_s13, 0  ;;  %s384_s14 = smov [#allocation2]  }
   0x4   : > { %p92_p3 = pnand %p309_p0, %p91_p1  ;;  %s104_s15 = sshll.u32 %s384_s14, 4  ;;  %s105_s15 = int_to_ptr.vmem [resolvable:$true] %s104_s15 }
   0x5   : > { %s385_s16 = smov 128   ;;  %s386_s17 = smov 8  }
   0x6   : > { %p324_p4 = pneg %p92_p3  ;;  %128 = sbr.rel (%p92_p3) target bundleno = 176 (0xb0), region = 28 }
   0x8   : > { %p325_p5 = pnand %p328_p2, %p324_p4 }
   0xa   : > { %327 = dma.hbm_to_vmem [thread:$0]  (!%p325_p5), %s103_s12, 4096, %s105_s15, [#allocation3], %s385_s16, %s385_s16, %s386_s17  }
   0xb   : > { %377 = dma.done.wait (%p328_p2), [#allocation3], 4096  }
   0xc   : > { %379 = vsyncadd (%p328_p2), [#allocation3], 4294963200  ;;  %p150_p6 = scmp.lt.s32.totalorder %s307_s13, 1  ;;  %v175_v0 = vld [vmem:[#allocation2 + $0x78] sm:$0xff]  ;;  %v174_v2 = vld [vmem:[#allocation2 + $0x70] sm:$0xff]  ;;  %vm239_vm0 = vcmask 519168  }
   0xd   : > { %v191_v1 = vld [vmem:[#allocation2 + $0xf8] sm:$0xff]  ;;  %198 = vmatpush.msra.mxu0 %v175_v0  ;;  %v190_v3 = vld [vmem:[#allocation2 + $0xf0] sm:$0xff]  ;;  %v173_v4 = vld [vmem:[#allocation2 + $0x68] sm:$0xff]  ;;  %v387_v35 = vmov 0.0  }
   0xe   : > { %s434_s13 = smov (!%p150_p6, %s307_s13), 1  ;;  %218 = vmatpush.msra.mxu1 %v191_v1  ;;  %v189_v5 = vld [vmem:[#allocation2 + $0xe8] sm:$0xff]  ;;  %v172_v6 = vld [vmem:[#allocation2 + $0x60] sm:$0xff]  ;;  %v171_v8 = vld [vmem:[#allocation2 + $0x58] sm:$0xff] }
   0xf   : > { %199 = vmatpush.msra.mxu0 %v174_v2  ;;  %v188_v7 = vld [vmem:[#allocation2 + $0xe0] sm:$0xff]  ;;  %s319_s18 = sshll.u32 %s434_s13, 3  ;;  %v187_v9 = vld [vmem:[#allocation2 + $0xd8] sm:$0xff]  ;;  %v170_v10 = vld [vmem:[#allocation2 + $0x50] sm:$0xff] }
  0x10   : > { %219 = vmatpush.msra.mxu1 %v190_v3  ;;  %s154_s21 = scalar_lea.vmem %s430_s0, %s319_s18  ;;  %v186_v11 = vld [vmem:[#allocation2 + $0xd0] sm:$0xff]  ;;  %v169_v12 = vld [vmem:[#allocation2 + $0x48] sm:$0xff]  ;;  %v168_v15 = vld [vmem:[#allocation2 + $0x40] sm:$0xff]  ;;  %s158_s24 = scalar_lea.vmem %s432_s2, %s319_s18 }
  0x11   : > { %200 = vmatpush.msra.mxu0 %v173_v4  ;;  %v185_v13 = vld [vmem:[#allocation2 + $0xc8] sm:$0xff]  ;;  %v159_v14 = vld [vmem:[%s154_s21] sm:$0xff]  ;;  %v184_v16 = vld [vmem:[#allocation2 + $0xc0] sm:$0xff]  ;;  %241 = vst.msk [vmem:[%s158_s24 + $0x4] sm:$0xf] %vm239_vm0, %v387_v35 }
  0x12   : > { %220 = vmatpush.msra.mxu1 %v189_v5  ;;  %193 = vst [vmem:[#allocation1] ss:$2 sm:$0xff] %v159_v14  ;;  %v167_v17 = vld [vmem:[#allocation2 + $0x38] sm:$0xff]  ;;  %v166_v19 = vld [vmem:[#allocation2 + $0x30] sm:$0xff]  ;;  %v165_v21 = vld [vmem:[#allocation2 + $0x28] sm:$0xff] }
  0x13   : > { %201 = vmatpush.msra.mxu0 %v172_v6  ;;  %v183_v18 = vld [vmem:[#allocation2 + $0xb8] sm:$0xff]  ;;  %v182_v20 = vld [vmem:[#allocation2 + $0xb0] sm:$0xff]  ;;  %v181_v22 = vld [vmem:[#allocation2 + $0xa8] sm:$0xff] }
  0x14   : > { %221 = vmatpush.msra.mxu1 %v188_v7  ;;  %v164_v23 = vld [vmem:[#allocation2 + $0x20] sm:$0xff]  ;;  %v163_v25 = vld [vmem:[#allocation2 + $0x18] sm:$0xff]  ;;  %v162_v27 = vld [vmem:[#allocation2 + $0x10] sm:$0xff] }
  0x15   : > { %202 = vmatpush.msra.mxu0 %v171_v8  ;;  %v180_v24 = vld [vmem:[#allocation2 + $0xa0] sm:$0xff]  ;;  %v179_v26 = vld [vmem:[#allocation2 + $0x98] sm:$0xff]  ;;  %v178_v28 = vld [vmem:[#allocation2 + $0x90] sm:$0xff] }
  0x16   : > { %222 = vmatpush.msra.mxu1 %v187_v9  ;;  %v161_v29 = vld [vmem:[#allocation2 + $0x8] sm:$0xff]  ;;  %v160_v31 = vld [vmem:[#allocation2] sm:$0xff] }
  0x17   : > { %203 = vmatpush.msra.mxu0 %v170_v10  ;;  %v177_v30 = vld [vmem:[#allocation2 + $0x88] sm:$0xff]  ;;  %v176_v32 = vld [vmem:[#allocation2 + $0x80] sm:$0xff] }
  0x18   : > { %223 = vmatpush.msra.mxu1 %v186_v11 }
  0x19   : > { %204 = vmatpush.msra.mxu0 %v169_v12  ;;  %v194_v33 = vld.sshfl [vmem:[#allocation1] sm:$0xff pattern:$0x75316420]  ;;  %v195_v34 = vld.sshfl [vmem:[#allocation1 + $0x8] sm:$0xff pattern:$0x75316420] }
  0x1a   : > { %224 = vmatpush.msra.mxu1 %v185_v13 }
  0x1b   : > { %205 = vmatpush.msra.mxu0 %v168_v15 }
  0x1c   : > { %225 = vmatpush.msra.mxu1 %v184_v16 }
  0x1d   : > { %206 = vmatpush.msra.mxu0 %v167_v17 }
  0x1e   : > { %226 = vmatpush.msra.mxu1 %v183_v18 }
  0x1f   : > { %207 = vmatpush.msra.mxu0 %v166_v19 }
  0x20   : > { %227 = vmatpush.msra.mxu1 %v182_v20 }
  0x21   : > { %208 = vmatpush.msra.mxu0 %v165_v21 }
  0x22   : > { %228 = vmatpush.msra.mxu1 %v181_v22 }
  0x23   : > { %209 = vmatpush.msra.mxu0 %v164_v23 }
  0x24   : > { %229 = vmatpush.msra.mxu1 %v180_v24 }
  0x25   : > { %210 = vmatpush.msra.mxu0 %v163_v25 }
  0x26   : > { %230 = vmatpush.msra.mxu1 %v179_v26 }
  0x27   : > { %211 = vmatpush.msra.mxu0 %v162_v27 }
  0x28   : > { %231 = vmatpush.msra.mxu1 %v178_v28 }
  0x29   : > { %212 = vmatpush.msra.mxu0 %v161_v29 }
  0x2a   : > { %232 = vmatpush.msra.mxu1 %v177_v30 }
  0x2b   : > { %213 = vmatpush.msra.mxu0 %v160_v31 }
  0x2c   : > { %233 = vmatpush.msra.mxu1 %v176_v32  ;;  %214 = vmatmul.f32.vlgmr.msra.gmra.mxu0 %v194_v33 }
  0x2d   : > { %234 = vmatmul.f32.vlgmr.msra.gmra.mxu1 %v195_v34 }
  0xa9   : > { %v215_v36 = vpop.f32.mrf.mxu0 }
  0xaa   : > { %v235_v37 = vpop.f32.mrf.mxu1 }
  0xab   : > { %v236_v38 = vadd.f32 %v235_v37, %v215_v36 }
  0xad   : > { %v238_v39 = vmul.f32 0.25, %v236_v38 }
  0xaf   : > { %240 = vst.msk [vmem:[%s158_s24] sm:$0xf] %vm239_vm0, %v238_v39 }
  0xb0 PF: > { %s13_s9 = sadd.s32 1, %s382_s9  }
  0xb1   : > { %p10_p7 = scmp.ge.s32.totalorder %s13_s9, 4  }
  0xb3   :  { %12 = sbr.rel (!%p10_p7) target bundleno = 1 (0x1), region = 63 }
  0xb8   :  { %261 = vsyncpa [#allocation3], 1 }
  0xb9   :  { %263 = vsyncpa [#allocation3 + $0x1], 1 }

</bundles_post_ra>
